<compile_context>
chip_gen: v7x
topology: tpu7x:2x2x1
jax: 0.10.0
libtpu: 0.0.40
codegen_flags: <defaults>
</compile_context>

<pallas_src>
from typing import NamedTuple

import jax
import jax.numpy as jnp
from jax.experimental import pallas as pl
from jax.experimental.pallas import tpu as pltpu


def _round_up(a: int, m: int) -> int:
    return ((a + m - 1) // m) * m


def _vmem_capacity_bytes() -> int:
    try:
        return int(pltpu.get_tpu_info().vmem_capacity_bytes)
    except Exception:
        return 64 << 20  # conservative fallback: v7x per-TensorCore VMEM


def _select_tiles(n: int, tm: int, tk: int, stream_width: int, out_width: int,
                  budget_bytes: int):
    """Pick (tm, tk): (8,128)-aligned, megacore-splittable, under a VMEM budget."""
    tm = min(tm, _round_up(n, 8))
    if n >= 16:  # keep >= 2 row blocks so the parallel axis shards across 2 TCs (v7x)
        tm = min(tm, _round_up((n + 1) // 2, 8))
    tk = min(tk, _round_up(n, 128))

    def footprint(tm_, tk_):
        return (2 * tm_ * tk_ * 2                 # adj tile, bf16, double-buffered
                + 2 * tk_ * stream_width * 2      # streamed operand, bf16
                + 2 * tm_ * out_width * 4         # output tile, f32
                + tm_ * stream_width * 4          # f32 accumulator scratch
                + 2 * stream_width * out_width * 2)  # resident weight (bf16)

    while footprint(tm, tk) > budget_bytes and tk > 128:
        tk = max(128, (tk // 2) // 128 * 128)
    while footprint(tm, tk) > budget_bytes and tm > 8:
        tm = max(8, (tm // 2) // 8 * 8)
    return tm, tk


class PreparedAdj(NamedTuple):
    """Cached adjacency: cast/pad + block-sparsity metadata. Reuse across layers."""
    adj_p: jax.Array      # (n_rows, n_cols) bf16, zero-padded
    block_ids: jax.Array  # (gi, gk) int32: nonzero k-blocks first; padding repeats last id
    block_cnt: jax.Array  # (gi,)   int32: number of nonzero k-blocks per row tile
    n: int
    tm: int
    tk: int


def prepare_adjacency(adj, *, tm: int = 512, tk: int = 2048,
                      stream_width: int = 256, out_width: int = 256,
                      dtype=jnp.bfloat16) -> PreparedAdj:
    """One-time adjacency preparation (hoisted out of the per-layer hot path)."""
    n = adj.shape[0]
    assert adj.shape == (n, n)
    budget = int(0.70 * _vmem_capacity_bytes())
    tm, tk = _select_tiles(n, tm, tk, stream_width, out_width, budget)
    n_rows = _round_up(n, tm)
    n_cols = _round_up(n, tk)

    # TODO(synk): per-generation adj quantization (fp8-e4m3 on v7x, int8 on
    # v5e/v6e) with the scale folded into the ReLU epilogue to halve adj bytes.
    adj_p = jnp.pad(adj.astype(dtype), ((0, n_rows - n), (0, n_cols - n)))

    gi, gk = n_rows // tm, n_cols // tk
    block_nz = jnp.any(adj_p.reshape(gi, tm, gk, tk) != 0, axis=(1, 3))  # (gi, gk)
    cnt = block_nz.sum(axis=1).astype(jnp.int32)                         # (gi,)
    # Sort key ~nz (False first) puts nonzero blocks at the front, ascending k.
    order = jnp.argsort(jnp.logical_not(block_nz), axis=1).astype(jnp.int32)
    last_valid = order[jnp.arange(gi), jnp.clip(cnt - 1, 0, gk - 1)]
    pos = jnp.arange(gk, dtype=jnp.int32)[None, :]
    # Padding slots repeat the last valid block id -> no re-DMA, compute is gated.
    block_ids = jnp.where(pos < cnt[:, None], order, last_valid[:, None])
    return PreparedAdj(adj_p, block_ids.astype(jnp.int32), cnt, n, tm, tk)


def _gcn_fused_kernel(ids_ref, cnt_ref, adj_ref, x_ref, w_ref, o_ref, acc_ref):
    """relu((adj @ x) @ W): accumulate adj_tile @ x_tile; weight matmul + relu at the end."""
    i = pl.program_id(0)
    s = pl.program_id(1)

    @pl.when(s == 0)
    def _():
        acc_ref[...] = jnp.zeros_like(acc_ref)

    @pl.when(s < cnt_ref[i])  # skip all-zero adjacency blocks
    def _():
        acc_ref[...] += jnp.dot(adj_ref[...], x_ref[...],
                                preferred_element_type=jnp.float32)

    @pl.when(s == pl.num_programs(1) - 1)
    def _():
        # bf16 x bf16 -> f32 epilogue matmul (avoid the multi-pass f32 MXU path).
        out = jnp.dot(acc_ref[...].astype(jnp.bfloat16), w_ref[...],
                      preferred_element_type=jnp.float32)
        o_ref[...] = jnp.maximum(out, 0.0).astype(o_ref.dtype)


def _gcn_spmm_relu_kernel(ids_ref, cnt_ref, adj_ref, sup_ref, o_ref, acc_ref):
    """relu(adj @ support): support = x @ W precomputed (F_in > F_out path)."""
    i = pl.program_id(0)
    s = pl.program_id(1)

    @pl.when(s == 0)
    def _():
        acc_ref[...] = jnp.zeros_like(acc_ref)

    @pl.when(s < cnt_ref[i])  # skip all-zero adjacency blocks
    def _():
        acc_ref[...] += jnp.dot(adj_ref[...], sup_ref[...],
                                preferred_element_type=jnp.float32)

    @pl.when(s == pl.num_programs(1) - 1)
    def _():
        o_ref[...] = jnp.maximum(acc_ref[...], 0.0).astype(o_ref.dtype)


def graph_convolution_forward(x, adj, weight, *, dropout: float = 0.0,
                              training: bool = False, key=None,
                              tm: int = 512, tk: int = 2048):
    """GCN layer forward: relu(adj @ (dropout(x) @ weight)) in one Pallas kernel.

    `adj` may be a dense (N, N) array or a PreparedAdj (cache the latter across
    layers / steps so the bf16 cast, padding and block scan are not redone).
    """
    if training and dropout > 0.0:
        # Inverted dropout (F.dropout semantics), glue in plain JAX.
        # TODO(synk): fuse dropout into the kernel via pltpu.prng_seed /
        # pltpu.prng_random_bits to avoid an extra HBM pass over x in training.
        keep = 1.0 - dropout
        mask = jax.random.bernoulli(key, keep, x.shape)
        x = jnp.where(mask, x / keep, 0.0)

    N, F_in = x.shape
    assert weight.shape[0] == F_in
    F_out = weight.shape[1]
    f_in_p = _round_up(F_in, 128)
    f_out_p = _round_up(F_out, 128)

    fuse_weight = f_in_p <= f_out_p           # stream x, apply W in the epilogue
    stream_w = f_in_p if fuse_weight else f_out_p

    if isinstance(adj, PreparedAdj):
        prep = adj
        assert prep.n == N
    else:
        assert adj.shape == (N, N)
        prep = prepare_adjacency(adj, tm=tm, tk=tk,
                                 stream_width=stream_w, out_width=f_out_p)
    adj_p, block_ids, block_cnt, _, tm, tk = prep
    n_rows, n_cols = adj_p.shape
    gi, gk = n_rows // tm, n_cols // tk

    if fuse_weight:
        kernel = _gcn_fused_kernel
        stream_p = jnp.pad(x.astype(jnp.bfloat16),
                           ((0, n_cols - N), (0, f_in_p - F_in)))
        w_p = jnp.pad(weight, ((0, f_in_p - F_in), (0, f_out_p - F_out))
                      ).astype(jnp.bfloat16)
        operands = (stream_p, w_p)
        in_specs = [
            pl.BlockSpec((tm, tk), lambda i, s, ids, cnt: (i, ids[i, s])),
            pl.BlockSpec((tk, f_in_p), lambda i, s, ids, cnt: (ids[i, s], 0)),
            pl.BlockSpec((f_in_p, f_out_p), lambda i, s, ids, cnt: (0, 0)),
        ]
        acc_cols = f_in_p
        kernel_flops = 2 * n_rows * n_cols * f_in_p + 2 * n_rows * f_in_p * f_out_p
    else:
        kernel = _gcn_spmm_relu_kernel
        # F_in > F_out: the support matmul is tiny relative to the N^2 spmm, so
        # do it up front (plain XLA) and stream the narrower (N, F_out) operand.
        support = jnp.dot(x.astype(jnp.float32), weight.astype(jnp.float32))
        stream_p = jnp.pad(support.astype(jnp.bfloat16),
                           ((0, n_cols - N), (0, f_out_p - F_out)))
        operands = (stream_p,)
        in_specs = [
            pl.BlockSpec((tm, tk), lambda i, s, ids, cnt: (i, ids[i, s])),
            pl.BlockSpec((tk, f_out_p), lambda i, s, ids, cnt: (ids[i, s], 0)),
        ]
        acc_cols = f_out_p
        kernel_flops = 2 * n_rows * n_cols * f_out_p

    # Explicit VMEM limit from the actual buffers (default scoped limit is only
    # 16-32 MiB); keep headroom and cap under the per-core physical capacity.
    buf_bytes = (2 * tm * tk * 2 + 2 * tk * stream_w * 2
                 + 2 * tm * f_out_p * 4 + tm * acc_cols * 4)
    if fuse_weight:
        buf_bytes += 2 * f_in_p * f_out_p * 2
    vmem_limit = int(min(buf_bytes + (8 << 20),
                         int(0.9 * _vmem_capacity_bytes())))

    bytes_accessed = adj_p.size * 2 + gi * stream_p.size * 2 + n_rows * f_out_p * 4
    if fuse_weight:
        bytes_accessed += w_p.size * 2
    cost = pl.CostEstimate(flops=kernel_flops, transcendentals=0,
                           bytes_accessed=bytes_accessed)

    out = pl.pallas_call(
        kernel,
        out_shape=jax.ShapeDtypeStruct((n_rows, f_out_p), jnp.float32),
        grid_spec=pltpu.PrefetchScalarGridSpec(
            num_scalar_prefetch=2,
            grid=(gi, gk),
            in_specs=in_specs,
            out_specs=pl.BlockSpec((tm, f_out_p), lambda i, s, ids, cnt: (i, 0)),
            scratch_shapes=[pltpu.VMEM((tm, acc_cols), jnp.float32)],
        ),
        compiler_params=pltpu.CompilerParams(
            dimension_semantics=("parallel", "arbitrary"),
            vmem_limit_bytes=vmem_limit,
        ),
        cost_estimate=cost,
    )(block_ids, block_cnt, adj_p, *operands)

    return out[:N, :F_out]


def xavier_uniform(key, shape, dtype=jnp.float32):
    fan_in, fan_out = shape
    limit = (6.0 / (fan_in + fan_out)) ** 0.5
    return jax.random.uniform(key, shape, dtype, minval=-limit, maxval=limit)


def _make_norm_adj(key, n, density=0.05, n_communities=2):
    """Symmetric-normalized adjacency; block-diagonal communities so some
    (tm, tk) blocks are exactly zero and the kernel's block-skip path runs."""
    a = (jax.random.uniform(key, (n, n)) < density).astype(jnp.float32)
    comm = jnp.arange(n) // (n // n_communities)
    a = a * (comm[:, None] == comm[None, :]).astype(jnp.float32)
    a = jnp.maximum(a, a.T) + jnp.eye(n, dtype=jnp.float32)
    d_inv_sqrt = 1.0 / jnp.sqrt(jnp.sum(a, axis=1))
    return a * d_inv_sqrt[:, None] * d_inv_sqrt[None, :]


if __name__ == "__main__":
    N = 256
    key = jax.random.PRNGKey(0)
    k_adj, k_x1, k_w1, k_x2, k_w2 = jax.random.split(key, 5)

    adj = _make_norm_adj(k_adj, N)

    # Adjacency prep hoisted out of the per-layer path (cached + reused below).
    # Small tiles so the demo exercises multi-block accumulation AND block
    # skipping (grid = (2, 2); off-diagonal community blocks are all-zero).
    prep = prepare_adjacency(adj, tm=128, tk=128)

    # Layer 1: F_in <= F_out -> fused (adj @ x) @ W path.
    F_IN1, F_OUT1 = 64, 128
    x1 = jax.random.normal(k_x1, (N, F_IN1), dtype=jnp.float32)
    w1 = xavier_uniform(k_w1, (F_IN1, F_OUT1))
    out1 = jax.block_until_ready(
        graph_convolution_forward(x1, prep, w1, dropout=0.0, training=False))
    ref1 = jnp.maximum(adj @ (x1 @ w1), 0.0)
    assert out1.shape == (N, F_OUT1)
    assert jnp.allclose(out1, ref1, atol=1e-2, rtol=1e-2), \
        f"fused path max abs diff = {jnp.max(jnp.abs(out1 - ref1))}"

    # Layer 2 (reuses the cached adjacency): F_in > F_out -> adj @ support path.
    F_IN2, F_OUT2 = 256, 64
    x2 = jax.random.normal(k_x2, (N, F_IN2), dtype=jnp.float32)
    w2 = xavier_uniform(k_w2, (F_IN2, F_OUT2))
    out2 = jax.block_until_ready(
        graph_convolution_forward(x2, prep, w2, dropout=0.0, training=False))
    ref2 = jnp.maximum(adj @ (x2 @ w2), 0.0)
    assert out2.shape == (N, F_OUT2)
    assert jnp.allclose(out2, ref2, atol=1e-2, rtol=1e-2), \
        f"spmm path max abs diff = {jnp.max(jnp.abs(out2 - ref2))}"

    print("KERNEL_OK")
</pallas_src>

<mosaic_0001>
module attributes {stable_mosaic.version = 11 : i64} {
  func.func @_gcn_fused_kernel(%arg0: i32, %arg1: i32, %arg2: memref<2x2xi32, #tpu.memory_space<smem>>, %arg3: memref<2xi32, #tpu.memory_space<smem>>, %arg4: memref<128x128xbf16, #tpu.memory_space<vmem>>, %arg5: memref<128x128xbf16, #tpu.memory_space<vmem>>, %arg6: memref<128x128xbf16, #tpu.memory_space<vmem>>, %arg7: memref<128x128xf32, #tpu.memory_space<vmem>>, %arg8: memref<128x128xf32, #tpu.memory_space<vmem>>) attributes {dimension_semantics = [#tpu.dimension_semantics<parallel>, #tpu.dimension_semantics<arbitrary>], iteration_bounds = array<i64: 2, 2>, scalar_prefetch = 2 : i64, scratch_operands = 1 : i64, tpu.core_type = #tpu.core_type<tc>, window_params = [{transform_indices = @transform_0, window_bounds = array<i64: 128, 128>}, {transform_indices = @transform_1, window_bounds = array<i64: 128, 128>}, {pipeline_mode = #tpu.pipeline_mode<synchronous>, transform_indices = @transform_2, window_bounds = array<i64: 128, 128>}, {transform_indices = @transform_3, window_bounds = array<i64: 128, 128>}]} {
    %c0_i32 = arith.constant 0 : i32
    %0 = arith.cmpi eq, %arg1, %c0_i32 : i32
    %1 = arith.extui %0 : i1 to i32
    %c0_i32_0 = arith.constant 0 : i32
    %2 = arith.cmpi ne, %1, %c0_i32_0 : i32
    scf.if %2 {
      %cst = arith.constant 0.000000e+00 : f32
      %11 = vector.broadcast %cst : f32 to vector<128x128xf32>
      %c0 = arith.constant 0 : index
      %c0_3 = arith.constant 0 : index
      %12 = vector.load %arg8[%c0, %c0_3] : memref<128x128xf32, #tpu.memory_space<vmem>>, vector<128x128xf32>
      tpu.vector_store %arg8[%c0, %c0_3], %11 {strides = array<i32>} : memref<128x128xf32, #tpu.memory_space<vmem>>, vector<128x128xf32>,
    } else {
    }
    %3 = arith.index_cast %arg0 : i32 to index
    %4 = memref.load %arg3[%3] : memref<2xi32, #tpu.memory_space<smem>>
    %5 = arith.cmpi slt, %arg1, %4 : i32
    %6 = arith.extui %5 : i1 to i32
    %c0_i32_1 = arith.constant 0 : i32
    %7 = arith.cmpi ne, %6, %c0_i32_1 : i32
    scf.if %7 {
      %c0 = arith.constant 0 : index
      %c0_3 = arith.constant 0 : index
      %11 = vector.load %arg8[%c0, %c0_3] : memref<128x128xf32, #tpu.memory_space<vmem>>, vector<128x128xf32>
      %c0_4 = arith.constant 0 : index
      %c0_5 = arith.constant 0 : index
      %12 = vector.load %arg4[%c0_4, %c0_5] : memref<128x128xbf16, #tpu.memory_space<vmem>>, vector<128x128xbf16>
      %c0_6 = arith.constant 0 : index
      %c0_7 = arith.constant 0 : index
      %13 = vector.load %arg5[%c0_6, %c0_7] : memref<128x128xbf16, #tpu.memory_space<vmem>>, vector<128x128xbf16>
      %cst = arith.constant dense<0.000000e+00> : vector<128x128xf32>
      %14 = tpu.matmul %12, %13, %cst {dimension_numbers = #tpu.dot_dimension_numbers<[1], [0], [0], [1], [0, 0, 1, 1], [], []>} : vector<128x128xbf16>, vector<128x128xbf16>, vector<128x128xf32> -> vector<128x128xf32>
      %15 = arith.addf %11, %14 : vector<128x128xf32>
      %c0_8 = arith.constant 0 : index
      %c0_9 = arith.constant 0 : index
      %16 = vector.load %arg8[%c0_8, %c0_9] : memref<128x128xf32, #tpu.memory_space<vmem>>, vector<128x128xf32>
      tpu.vector_store %arg8[%c0_8, %c0_9], %15 {strides = array<i32>} : memref<128x128xf32, #tpu.memory_space<vmem>>, vector<128x128xf32>,
    } else {
    }
    %c1_i32 = arith.constant 1 : i32
    %8 = arith.cmpi eq, %arg1, %c1_i32 : i32
    %9 = arith.extui %8 : i1 to i32
    %c0_i32_2 = arith.constant 0 : i32
    %10 = arith.cmpi ne, %9, %c0_i32_2 : i32
    scf.if %10 {
      %c0 = arith.constant 0 : index
      %c0_3 = arith.constant 0 : index
      %11 = vector.load %arg8[%c0, %c0_3] : memref<128x128xf32, #tpu.memory_space<vmem>>, vector<128x128xf32>
      %12 = arith.truncf %11 : vector<128x128xf32> to vector<128x128xbf16>
      %c0_4 = arith.constant 0 : index
      %c0_5 = arith.constant 0 : index
      %13 = vector.load %arg6[%c0_4, %c0_5] : memref<128x128xbf16, #tpu.memory_space<vmem>>, vector<128x128xbf16>
      %cst = arith.constant dense<0.000000e+00> : vector<128x128xf32>
      %14 = tpu.matmul %12, %13, %cst {dimension_numbers = #tpu.dot_dimension_numbers<[1], [0], [0], [1], [0, 0, 1, 1], [], []>} : vector<128x128xbf16>, vector<128x128xbf16>, vector<128x128xf32> -> vector<128x128xf32>
      %cst_6 = arith.constant 0.000000e+00 : f32
      %15 = vector.broadcast %cst_6 : f32 to vector<128x128xf32>
      %16 = arith.maximumf %14, %15 : vector<128x128xf32>
      %c0_7 = arith.constant 0 : index
      %c0_8 = arith.constant 0 : index
      %17 = vector.load %arg7[%c0_7, %c0_8] : memref<128x128xf32, #tpu.memory_space<vmem>>, vector<128x128xf32>
      tpu.vector_store %arg7[%c0_7, %c0_8], %16 {strides = array<i32>} : memref<128x128xf32, #tpu.memory_space<vmem>>, vector<128x128xf32>,
    } else {
    }
    return
  }
  func.func @transform_0(%arg0: i32, %arg1: i32, %arg2: memref<2x2xi32, #tpu.memory_space<smem>>, %arg3: memref<2xi32, #tpu.memory_space<smem>>) -> (i32, i32) {
    %0 = arith.index_cast %arg0 : i32 to index
    %1 = arith.index_cast %arg1 : i32 to index
    %2 = memref.load %arg2[%0, %1] : memref<2x2xi32, #tpu.memory_space<smem>>
    %c0_i32 = arith.constant 0 : i32
    return %arg0, %2 : i32, i32
  }
  func.func @transform_1(%arg0: i32, %arg1: i32, %arg2: memref<2x2xi32, #tpu.memory_space<smem>>, %arg3: memref<2xi32, #tpu.memory_space<smem>>) -> (i32, i32) {
    %0 = arith.index_cast %arg0 : i32 to index
    %1 = arith.index_cast %arg1 : i32 to index
    %2 = memref.load %arg2[%0, %1] : memref<2x2xi32, #tpu.memory_space<smem>>
    %c0_i32 = arith.constant 0 : i32
    %c0_i32_0 = arith.constant 0 : i32
    return %2, %c0_i32 : i32, i32
  }
  func.func @transform_2(%arg0: i32, %arg1: i32, %arg2: memref<2x2xi32, #tpu.memory_space<smem>>, %arg3: memref<2xi32, #tpu.memory_space<smem>>) -> (i32, i32) {
    %c0_i32 = arith.constant 0 : i32
    %c0_i32_0 = arith.constant 0 : i32
    %c0_i32_1 = arith.constant 0 : i32
    return %c0_i32, %c0_i32_0 : i32, i32
  }
  func.func @transform_3(%arg0: i32, %arg1: i32, %arg2: memref<2x2xi32, #tpu.memory_space<smem>>, %arg3: memref<2xi32, #tpu.memory_space<smem>>) -> (i32, i32) {
    %c0_i32 = arith.constant 0 : i32
    %c0_i32_0 = arith.constant 0 : i32
    return %arg0, %c0_i32 : i32, i32
  }
}

</mosaic_0001>

<bundles_post_ra>
// kernel: tpu_custom_call.1
= control target key start
LH: loop header
LB: loop body
LE: loop exit
PB: predicated region body
PF: predicated region fallthrough
CT: control target
= control target key end

     0   :  { %s2128_s0 = inlined_call_operand.hbm [shape: s32[2,2], index: 0, kind: input, shape index: {}]   ;;  %s2129_s2 = inlined_call_operand.hbm [shape: bf16[256,256], index: 2, kind: input, shape index: {}]   ;;  %s2130_s3 = inlined_call_operand.hbm [shape: bf16[256,128], index: 3, kind: input, shape index: {}]   ;;  %s2131_s4 = inlined_call_operand.hbm [shape: bf16[128,128], index: 4, kind: input, shape index: {}]   ;;  %s2132_s5 = inlined_call_operand.hbm [shape: f32[256,128], index: 5, kind: output, shape index: {}]   ;;  %s2133_s1 = inlined_call_operand.vmem [shape: s32[2], index: 1, kind: input, shape index: {}]  }
   0x1   :  { %2156 = sst [smem:[#allocation34_spill]] %s2131_s4  ;;  %s1356_s20 = scalar_lea.hbm %s2128_s0, 32 }
   0x2   :  { %2157 = sst [smem:[#allocation35_spill]] %s2132_s5  ;;  %p1357_p0 = scmp.ne.s32.totalorder %s2128_s0, %s1356_s20 }
   0x3   :  { %p1360_p1 = scmp.lt.u32.totalorder %s1356_s20, %s2128_s0 }
   0x5   :  { %p1362_p2 = pnand %p1360_p1, %p1357_p0 }
   0x7   :  { %1365 = shalt.err (!%p1362_p2)  }
   0x8   :  { %s1624_s25 = smov [#allocation4]   ;;  %s12_s30 = sshll.u32 %s2133_s1, 4  ;;  %s13_s30 = int_to_ptr.vmem [resolvable:$true] %s12_s30 }
   0x9   :  { %11 = dma.hbm_to_smem %s2128_s0, 32, %s1624_s25, [#allocation3] }
   0xa   :  { %s1366_s6 = scalar_lea.vmem %s13_s30, 16  ;;  %p1371_p4 = scmp.lt.s32.totalorder %s13_s30, %s13_s30 }
   0xb   :  { %p1367_p3 = scmp.ne.s32.totalorder %s13_s30, %s1366_s6  ;;  %p1372_p5 = scmp.lt.s32.totalorder %s1366_s6, %s1366_s6 }
   0xd   :  { %p1373_p6 = por %p1372_p5, %p1371_p4 }
   0xf   :  { %p1374_p7 = pnand %p1373_p6, %p1367_p3 }
  0x11   :  { %1377 = shalt.err (!%p1374_p7)  }
  0x12   :  { %s1625_s7 = smov [#allocation5]  }
  0x13   :  { %15 = dma.vmem_to_smem %s13_s30, 16, %s1625_s7, [#allocation3] }
  0x14   :  { %1550 = dma.done.wait [#allocation3], 48 }
  0x15   :  { %1551 = vsyncadd [#allocation3], 4294967248 }
  0x16   :  { %17 = sfence }
  0x17   :  { %18 = vsyncpa [#allocation7], 0 }
  0x18   :  { %20 = vsyncpa [#allocation7 + $0x1], 0 }
  0x19   :  { %21 = vsyncpa [#allocation10], 0 }
  0x1a   :  { %23 = vsyncpa [#allocation10 + $0x1], 0 }
  0x1b   :  { %24 = vsyncpa [#allocation8], 0 }
  0x1c   :  { %26 = vsyncpa [#allocation8 + $0x1], 0  ;;  %s1681_s0 = smov 0   ;;  %s1683_s1 = smov 0  }
  0x1d   :  { %s1685_s8 = smov 0   ;;  %s1687_s9 = smov 0  }
  0x1e   :  { %s1689_s10 = smov 0   ;;  %s1691_s11 = smov 0  }
  0x1f   :  { %s1693_s12 = smov 0   ;;  %s1695_s13 = smov 0  }
  0x20   :  { %s1697_s14 = smov 0   ;;  %s1699_s15 = smov 0  }
  0x21   :  { %s1701_s16 = smov 0   ;;  %s1703_s17 = smov 0  }
  0x22   :  { %s1705_s18 = smov 0   ;;  %s1707_s19 = smov 0  }
  0x23 LB: > { %2158 = sst [smem:[#allocation22_spill]] %s1570_s0  ;;  %s1748_s20 = sadd.s32 4294967295, %s1622_s19   ;;  %s1622_s19 = sphi %s1707_s19, %s32_s19   ;;  %s1618_s18 = sphi %s1705_s18, %s2225_s18   ;;  %s1614_s17 = sphi %s1703_s17, %s2212_s17   ;;  %s1610_s16 = sphi %s1701_s16, %s2224_s16   ;;  %s1606_s15 = sphi %s1699_s15, %s2223_s15   ;;  %s1602_s14 = sphi %s1697_s14, %s2222_s14   ;;  %s1598_s13 = sphi %s1695_s13, %s2221_s13   ;;  %s1594_s12 = sphi %s1693_s12, %s2220_s12   ;;  %s1590_s11 = sphi %s1691_s11, %s2219_s11   ;;  %s1586_s10 = sphi %s1689_s10, %s2218_s10   ;;  %s1582_s9 = sphi %s1687_s9, %s2217_s9   ;;  %s1578_s8 = sphi %s1685_s8, %s2208_s8   ;;  %s1574_s1 = sphi %s1683_s1, %s2216_s1   ;;  %s1570_s0 = sphi %s1681_s0, %s2215_s0  }
  0x24   : > { %2159 = sst [smem:[#allocation23_spill]] %s1578_s8  ;;  %p82_p8 = scmp.ne.s32.totalorder %s1598_s13, %s1594_s12 }
  0x25   : > { %2160 = sst [smem:[#allocation24_spill]] %s1606_s15  ;;  %p2135_p9 = scmp.eq.s32.totalorder %s1748_s20, 0 }
  0x26   : > { %2161 = sst [smem:[#allocation25_spill]] %s1610_s16  ;;  %s989_s21 = sadd.s32 4294967294, %s1622_s19  }
  0x27   : > { %2162 = sst [smem:[#allocation26_spill]] %s1614_s17  ;;  %p124_p10 = scmp.ne.s32.totalorder %s1586_s10, %s1582_s9 }
  0x28   : > { %2163 = sst [smem:[#allocation27_spill]] %s1618_s18  ;;  %p1756_p11 = por %p2135_p9, %p82_p8 }
  0x29   : > { %p168_p12 = scmp.ne.s32.totalorder %s1578_s8, %s1574_s1  ;;  %p1764_p13 = por %p124_p10, %p2135_p9 }
  0x2a   : > { %s2164_s22 = scalar_select %p1756_p11, 1, 0 }
  0x2b   : > { %s2165_s23 = scalar_select %p1764_p13, 1, 0 }
  0x2c   : > { %p169_p0 = scmp.eq.s32.totalorder %s1748_s20, 3  ;;  %p174_p1 = scmp.ne.s32.totalorder %s1574_s1, %s1570_s0 }
  0x2d   : > { %p175_p2 = scmp.eq.s32.totalorder %s989_s21, 3  ;;  %p994_p4 = scmp.ge.s32.totalorder %s1622_s19, 1 }
  0x2e   : > { %p1771_p3 = por %p169_p0, %p168_p12  ;;  %p182_p6 = scmp.lt.s32.totalorder %s1622_s19, 5 }
  0x2f   : > { %p1776_p5 = por %p175_p2, %p174_p1  ;;  %s1626_s27 = smov [#allocation11]  }
  0x30   : > { %s2166_s24 = scalar_select %p1771_p3, 1, 0 }
  0x31   : > { %s2168_s25 = scalar_select %p1776_p5, 1, 0 }
  0x32   : > { %2167 = sst [smem:[#allocation28_spill]] %s2166_s24  ;;  %p1781_p7 = pnand %p994_p4, %p182_p6 }
  0x33   : > { %2169 = sst [smem:[#allocation29_spill]] %s2168_s25  ;;  %s194_s28 = sshll.u32 %s1626_s27, 4  ;;  %s195_s28 = int_to_ptr.vmem [resolvable:$true] %s194_s28 }
  0x34   : > { %s2170_s26 = scalar_select %p1781_p7, 1, 0 }
  0x35   : > { %p1188_p8 = pneg %p1781_p7  ;;  %s2172_s4 = sld [smem:[#allocation34_spill]] }
  0x37   : > { %p1789_p10 = pnand %p1188_p8, %p2135_p9 }
  0x39   : > { %p1380_p0 = pneg %p1789_p10 }
  0x3b   : > { %s1378_s7 = scalar_lea.hbm %s2172_s4, 1024 }
  0x3c   : > { %p1379_p12 = scmp.ne.s32.totalorder %s2172_s4, %s1378_s7  ;;  %p1385_p4 = scmp.lt.u32.totalorder %s1378_s7, %s2172_s4 }
  0x3e   : > { %p1381_p1 = pnand %p1380_p0, %p1379_p12 }
  0x40   : > { %p1382_p2 = pneg %p1381_p1 }
  0x42   : > { %p1387_p6 = pnand %p1385_p4, %p1382_p2 }
  0x44   : > { %1390 = shalt.err (!%p1387_p6)
}
  0x45   : > { %s1391_s25 = scalar_lea.vmem %s195_s28, 1024  ;;  %p1399_p3 = scmp.lt.s32.totalorder %s195_s28, %s195_s28 }
  0x46   : > { %p1392_p8 = scmp.ne.s32.totalorder %s195_s28, %s1391_s25  ;;  %p1400_p13 = scmp.lt.s32.totalorder %s1391_s25, %s1391_s25 }
  0x48   : > { %p1394_p9 = pnand %p1392_p8, %p1380_p0  ;;  %p1401_p11 = por %p1400_p13, %p1399_p3 }
  0x4a   : > { %p1395_p5 = pneg %p1394_p9 }
  0x4c   : > { %p1402_p7 = pnand %p1401_p11, %p1395_p5 }
  0x4e   : > { %1405 = shalt.err (!%p1402_p7)
}
  0x4f   : > { %s2140_s30 = smov 64   ;;  %s2142_s6 = smov 4  }
  0x50   : > { %1191 = dma.hbm_to_vmem [thread:$0]  (!%p1789_p10), %s2172_s4, 1024, %s195_s28, [#allocation10], %s2140_s30, %s2140_s30, %s2142_s6  }
  0x51   : > { %s41_s25 = sadd.s32 1, %s1614_s17  ;;  %s44_s12 = sadd.s32 1, %s1618_s18 }
  0x52   : > { %p42_p9 = scmp.ge.s32.totalorder %s41_s25, 2  ;;  %s48_s21 = sshra.s32 %s1614_s17, 7 }
  0x53   : > { %s50_s29 = sadd.s32 %s1618_s18, %s48_s21  ;;  %s53_s27 = sand.u32 127, %s1614_s17 }
  0x54   : > { %s2227_s25 = smov (%p42_p9, %s41_s25), 0  ;;  %s2229_s12 = smov (!%p42_p9, %s44_s12), %s1618_s18 }
  0x55   : > { %2173 = sst [smem:[#allocation30_spill]] %s2227_s25  ;;  %p46_p11 = scmp.ge.s32.totalorder %s2229_s12, 2 }
  0x56   : > { %s990_s7 = sshll.u32 %s50_s29, 7  ;;  %s56_s28 = sshra.s32 %s2227_s25, 7 }
  0x57   : > { %s2231_s12 = smov (%p46_p11, %s2229_s12), 0  ;;  %s1823_s9 = sadd.s32 %s990_s7, %s53_s27 }
  0x58   : > { %2174 = sst [smem:[#allocation31_spill]] %s2231_s12  ;;  %s61_s30 = sand.u32 127, %s2227_s25 }
  0x59   : > { %s55_s21 = sld [smem:[#allocation4 + %s1823_s9]]  ;;  %s58_s6 = sadd.s32 %s56_s28, %s2231_s12 }
  0x5a   : > { %s991_s4 = sshll.u32 %s58_s6, 7  ;;  %s64_s17 = ssub.s32 %s1618_s18, %s2231_s12 }
  0x5b   : > { %s158_s29 = sadd.s32 1, %s1578_s8  ;;  %s62_s0 = sadd.s32 %s991_s4, %s61_s30 }
  0x5c   : > { %s63_s5 = sld [smem:[#allocation4 + %s62_s0]]  ;;  %p76_p13 = scmp.ne.s32.totalorder %s1602_s14, %s1598_s13 }
  0x5d   : > { %p77_p3 = scmp.eq.s32.totalorder %s1622_s19, 0  ;;  %p156_p5 = scmp.eq.s32.totalorder %s64_s17, 0 }
  0x5e   : > { %s2149_s27 = sand.u32 1, %s1602_s14   ;;  %s69_s25 = sadd.s32 1, %s1602_s14 }
  0x5f   : > { %s1836_s7 = scalar_select %p156_p5, %s1578_s8, %s158_s29  }
  0x60   : > { %s997_s28 = sshll.u32 %s2149_s27, 6  ;;  %p78_p7 = por %p77_p3, %p76_p13 }
  0x61   : > { %2175 = sst [smem:[#allocation32_spill]] %s1836_s7  ;;  %p2154_p10 = scmp.lt.s32.totalorder %s1622_s19, 4 }
  0x62   : > { %s99_s6 = sld [smem:[#allocation4 + %s1823_s9]]  ;;  %s65_s4 = ssub.s32 %s55_s21, %s63_s5 }
  0x63   : > { %s66_s30 = sor.u32 %s65_s4, %s64_s17  ;;  %p1847_p0 = pnand %p2154_p10, %p78_p7 }
  0x64   : > { %p67_p12 = scmp.eq.s32.totalorder %s66_s30, 0  ;;  %s212_s5 = scalar_lea.vmem [#allocation6], %s997_s28 }
  0x65   : > { %s1176_s12 = scalar_select %p78_p7, [#allocation4], [#allocation13] }
  0x66   : > { %s1852_s27 = scalar_select %p67_p12, %s1602_s14, %s69_s25  }
  0x67   : > { %s1177_s7 = scalar_select %p78_p7, %s1823_s9, 0 }
  0x68   : > { %2177 = sst [smem:[#allocation33_spill]] %s1852_s27  ;;  %s2233_s12 = smov (!%p2154_p10, %s1176_s12), [#allocation15] }
  0x69   : > { %s2235_s7 = smov (!%p2154_p10, %s1177_s7), 0  ;;  %s229_s21 = sshll.u32 %s212_s5, 4  ;;  %s1863_s21 = int_to_ptr.vmem [resolvable:$true] %s229_s21 }
  0x6a   : > { %s220_s17 = sld [smem:[%s2233_s12 + %s2235_s7]]  ;;  %p118_p1 = scmp.ne.s32.totalorder %s1590_s11, %s1586_s10 }
  0x6b   : > { %s107_s4 = sld [smem:[#allocation4 + %s62_s0]]  ;;  %s1043_s30 = sshll.u32 %s1618_s18, 5 }
  0x6c   : > { %s241_s8 = sand.u32 1, %s1590_s11   ;;  %p1868_p2 = por %p118_p1, %p77_p3 }
  0x6d   : > { %s1872_s16 = sshll.u32 %s241_s8, 6  ;;  %s2180_s18 = sand.u32 1, %s1602_s14  }
  0x6e   : > { %s2178_s25 = scalar_select %p1868_p2, 1, 0 }
  0x6f   : > { %s1885_s15 = scalar_lea.sflag [#allocation7], %s2180_s18  ;;  %p1408_p8 = pneg %p1847_p0 }
  0x70   : > { %s226_s27 = sadd.s32 %s1043_s30, %s220_s17  ;;  %s1411_s17 = scalar_lea.hbm %s2129_s2, 4096 }
  0x71   : > { %s1001_s28 = sshll.u32 %s226_s27, 6  ;;  %s108_s5 = ssub.s32 %s99_s6, %s107_s4 }
  0x72   : > { %s1877_s7 = scalar_lea.hbm %s2129_s2, %s1001_s28  ;;  %p1879_p4 = scmp.eq.s32.totalorder %s108_s5, 0 }
  0x73   : > { %s1406_s8 = scalar_lea.hbm %s1877_s7, 1024  ;;  %p1412_p13 = scmp.lt.u32.totalorder %s1877_s7, %s2129_s2 }
  0x74   : > { %p1407_p6 = scmp.ne.s32.totalorder %s1877_s7, %s1406_s8  ;;  %p1413_p3 = scmp.lt.u32.totalorder %s1411_s17, %s1406_s8 }
  0x75   : > { %p1415_p7 = scmp.lt.u32.totalorder %s1406_s8, %s1877_s7 }
  0x76   : > { %p1409_p9 = pnand %p1408_p8, %p1407_p6  ;;  %p1414_p5 = por %p1413_p3, %p1412_p13 }
  0x78   : > { %p1410_p11 = pneg %p1409_p9  ;;  %p1416_p12 = por %p1415_p7, %p1414_p5 }
  0x7a   : > { %p1417_p1 = pnand %p1416_p12, %p1410_p11 }
  0x7c   : > { %1420 = shalt.err (!%p1417_p1)
}
  0x7d   : > { %s1421_s18 = scalar_lea.vmem %s1863_s21, 1024  ;;  %s1629_s28 = smov [#allocation6]  }
  0x7e   : > { %p1422_p6 = scmp.ne.s32.totalorder %s1863_s21, %s1421_s18  ;;  %s1426_s5 = sshll.u32 %s1629_s28, 4  ;;  %s1427_s5 = int_to_ptr.vmem [resolvable:$false] %s1426_s5 }
  0x7f   : > { %s1428_s12 = scalar_lea.vmem %s1427_s5, 2048  ;;  %p1429_p2 = scmp.lt.s32.totalorder %s1863_s21, %s1427_s5 }
  0x80   : > { %p1424_p9 = pnand %p1422_p6, %p1408_p8  ;;  %p1430_p13 = scmp.lt.s32.totalorder %s1428_s12, %s1421_s18 }
  0x82   : > { %p1425_p10 = pneg %p1424_p9  ;;  %p1431_p3 = por %p1430_p13, %p1429_p2 }
  0x84   : > { %p1432_p5 = pnand %p1431_p3, %p1425_p10 }
  0x86   : > { %1435 = shalt.err (!%p1432_p5)
}
  0x87   : > { %s1630_s0 = smov 128   ;;  %s2181_s8 = smov 4  }
  0x88   : > { %s2182_s27 = smov 64   ;;  %s2183_s6 = sadd.s32 1, %s1590_s11 }
  0x89   : > { %1197 = dma.hbm_to_vmem [thread:$0]  (!%p1847_p0), %s1877_s7, 1024, %s1863_s21, %s1885_s15, %s1630_s0, %s2182_s27, %s2181_s8  }
  0x8a   : > { %s1920_s29 = scalar_select %p1879_p4, %s1590_s11, %s2183_s6  }
  0x8b   : > { %p2184_p10 = scmp.ne.s32.totalorder %s2178_s25, 0  ;;  %p2185_p2 = scmp.lt.s32.totalorder %s1622_s19, 4 }
  0x8c   : > { %s239_s24 = sand.u32 1, %s1622_s19   ;;  %s243_s21 = scalar_lea.vmem [#allocation9], %s1872_s16 }
  0x8d   : > { %s1179_s17 = scalar_select %p2184_p10, [#allocation4], [#allocation14] }
  0x8e   : > { %s2237_s9 = smov (!%p2184_p10, %s1823_s9), 0  ;;  %p2186_p8 = pmov %p2185_p2 }
  0x8f   : > { %s2239_s17 = smov (!%p2185_p2, %s1179_s17), [#allocation16]  ;;  %p2187_p11 = pmov %p2185_p2 }
  0x90   : > { %s2241_s9 = smov (!%p2186_p8, %s2237_s9), 0  ;;  %s258_s7 = sshll.u32 %s243_s21, 4  ;;  %s1941_s7 = int_to_ptr.vmem [resolvable:$true] %s258_s7 }
  0x91   : > { %p1935_p7 = pnand %p2187_p11, %p2184_p10  ;;  %s251_s15 = sld [smem:[%s2239_s17 + %s2241_s9]] }
  0x92   : > { %s1948_s25 = scalar_lea.sflag [#allocation10], %s239_s24  ;;  %s1441_s0 = scalar_lea.hbm %s2130_s3, 2048 }
  0x93   : > { %p1438_p4 = pneg %p1935_p7 }
  0x97   : > { %s1044_s30 = sshll.u32 %s251_s15, 10 }
  0x98   : > { %s1946_s5 = scalar_lea.hbm %s2130_s3, %s1044_s30 }
  0x99   : > { %s1436_s12 = scalar_lea.hbm %s1946_s5, 1024  ;;  %p1442_p6 = scmp.lt.u32.totalorder %s1946_s5, %s2130_s3 }
  0x9a   : > { %p1437_p0 = scmp.ne.s32.totalorder %s1946_s5, %s1436_s12  ;;  %p1443_p9 = scmp.lt.u32.totalorder %s1441_s0, %s1436_s12 }
  0x9b   : > { %p1445_p3 = scmp.lt.u32.totalorder %s1436_s12, %s1946_s5 }
  0x9c   : > { %p1439_p12 = pnand %p1438_p4, %p1437_p0  ;;  %p1444_p13 = por %p1443_p9, %p1442_p6 }
  0x9e   : > { %p1440_p1 = pneg %p1439_p12  ;;  %p1446_p5 = por %p1445_p3, %p1444_p13 }
  0xa0   : > { %p1447_p10 = pnand %p1446_p5, %p1440_p1 }
  0xa2   : > { %1450 = shalt.err (!%p1447_p10)
}
  0xa3   : > { %s1451_s15 = scalar_lea.vmem %s1941_s7, 1024  ;;  %s1631_s24 = smov [#allocation9]  }
  0xa4   : > { %p1452_p2 = scmp.ne.s32.totalorder %s1941_s7, %s1451_s15  ;;  %s1456_s21 = sshll.u32 %s1631_s24, 4  ;;  %s1457_s21 = int_to_ptr.vmem [resolvable:$false] %s1456_s21 }
  0xa5   : > { %s1458_s30 = scalar_lea.vmem %s1457_s21, 2048  ;;  %p1459_p0 = scmp.lt.s32.totalorder %s1941_s7, %s1457_s21 }
  0xa6   : > { %p1454_p8 = pnand %p1452_p2, %p1438_p4  ;;  %p1460_p12 = scmp.lt.s32.totalorder %s1458_s30, %s1451_s15 }
  0xa8   : > { %p1455_p11 = pneg %p1454_p8  ;;  %p1461_p6 = por %p1460_p12, %p1459_p0 }
  0xaa   : > { %p1462_p9 = pnand %p1461_p6, %p1455_p11 }
  0xac   : > { %1465 = shalt.err (!%p1462_p9)
}
  0xad   : > { %1202 = dma.hbm_to_vmem [thread:$0]  (!%p1935_p7), %s1946_s5, 1024, %s1941_s7, %s1948_s25, %s2182_s27, %s2182_s27, %s2181_s8  }
  0xae   : > { %p2189_p4 = scmp.ne.s32.totalorder %s2170_s26, 0 }
  0xaf   : > { %s272_s18 = sand.u32 (!%p2189_p4), 1, %s1598_s13   ;;  %p2190_p1 = scmp.ne.s32.totalorder (!%p2189_p4), %s2164_s22, 0 }
  0xb0   : > { %270 = sbr.rel (%p2189_p4) target bundleno = 774 (0x306), region = 32  ;;  %s1007_s28 = sshll.u32 (!%p2189_p4), %s272_s18, 6 }
  0xb1   : > { %s273_s12 = scalar_lea.sflag (!%p2189_p4), [#allocation7], %s272_s18  ;;  %s1982_s16 = scalar_lea.vmem (!%p2189_p4), [#allocation6], %s1007_s28 }
  0xb7   : > { %1553 = dma.done.wait (%p2190_p1), %s273_s12, 1024  }
  0xb8   : > { %1555 = vsyncadd (%p2190_p1), %s273_s12, 4294966272  ;;  %s281_s4 = sand.u32 1, %s1748_s20   ;;  %s283_s8 = sand.u32 1, %s1586_s10  }
  0xb9   : > { %s1008_s27 = sshll.u32 %s283_s8, 6  ;;  %s282_s26 = scalar_lea.sflag [#allocation10], %s281_s4 }
  0xba   : > { %s1990_s7 = scalar_lea.vmem [#allocation9], %s1008_s27  ;;  %p2191_p7 = scmp.ne.s32.totalorder %s2165_s23, 0 }
  0xbc   : > { %1557 = dma.done.wait (%p2191_p7), %s282_s26, 1024  }
  0xbd   : > { %1559 = vsyncadd (%p2191_p7), %s282_s26, 4294966272  ;;  %p2192_p13 = scmp.eq.s32.totalorder %s1748_s20, 0 }
  0xbf   : > { %1561 = dma.done.wait (%p2192_p13), [#allocation10], 1024   ;;  %p2193_p3 = pmov %p2192_p13 }
  0xc0   : > { %s314_s22 = sand.u32 1, %s1574_s1   ;;  %s2194_s9 = sld [smem:[#allocation24_spill]] }
  0xc1   : > { %1563 = vsyncadd (%p2193_p3), [#allocation10], 4294966272  ;;  %s1010_s5 = sshll.u32 %s314_s22, 7 }
  0xc2   : > { %s2003_s25 = scalar_lea.vmem [#allocation12], %s1010_s5 }
  0xc6   : > { %p1011_p5 = scmp.ne.s32.totalorder %s2194_s9, 0 }
  0xc7   : > { %v1632_v0 = vmov (!%p1011_p5), 0.0  }
  0xc8   : > { %340 = sbr.rel (%p1011_p5) target bundleno = 208 (0xd0), region = 48  ;;  %341 = vst [vmem:[#allocation2] sm:$0xff] (!%p1011_p5), %v1632_v0  ;;  %342 = vst [vmem:[#allocation2 + $0x8] sm:$0xff] (!%p1011_p5), %v1632_v0 }
  0xc9   : > { %343 = vst [vmem:[#allocation2 + $0x10] sm:$0xff] (!%p1011_p5), %v1632_v0  ;;  %344 = vst [vmem:[#allocation2 + $0x18] sm:$0xff] (!%p1011_p5), %v1632_v0 }
  0xca   : > { %345 = vst [vmem:[#allocation2 + $0x20] sm:$0xff] (!%p1011_p5), %v1632_v0  ;;  %346 = vst [vmem:[#allocation2 + $0x28] sm:$0xff] (!%p1011_p5), %v1632_v0 }
  0xcb   : > { %347 = vst [vmem:[#allocation2 + $0x30] sm:$0xff] (!%p1011_p5), %v1632_v0  ;;  %348 = vst [vmem:[#allocation2 + $0x38] sm:$0xff] (!%p1011_p5), %v1632_v0 }
  0xcc   : > { %349 = vst [vmem:[#allocation2 + $0x40] sm:$0xff] (!%p1011_p5), %v1632_v0  ;;  %350 = vst [vmem:[#allocation2 + $0x48] sm:$0xff] (!%p1011_p5), %v1632_v0 }
  0xcd   : > { %351 = vst [vmem:[#allocation2 + $0x50] sm:$0xff] (!%p1011_p5), %v1632_v0  ;;  %352 = vst [vmem:[#allocation2 + $0x58] sm:$0xff] (!%p1011_p5), %v1632_v0 }
  0xce   : > { %353 = vst [vmem:[#allocation2 + $0x60] sm:$0xff] (!%p1011_p5), %v1632_v0  ;;  %354 = vst [vmem:[#allocation2 + $0x68] sm:$0xff] (!%p1011_p5), %v1632_v0 }
  0xcf   : > { %355 = vst [vmem:[#allocation2 + $0x70] sm:$0xff] %v1632_v0  ;;  %356 = vst [vmem:[#allocation2 + $0x78] sm:$0xff] %v1632_v0 }
  0xd0 PF: > { %s2195_s20 = sld [smem:[#allocation25_spill]]  ;;  %s2196_s0 = sld [smem:[#allocation24_spill]] }
  0xd6   : > { %s357_s23 = sld [smem:[#allocation5 + %s2195_s20]] }
  0xdc   : > { %p1012_p10 = scmp.ge.s32.totalorder %s2196_s0, %s357_s23 }
  0xdd   : > { %v1332_v1 = vld [vmem:[%s1990_s7] sm:$0xff] (!%p1012_p10)   ;;  %v1333_v2 = vld [vmem:[%s1990_s7 + $0x8] sm:$0xff] (!%p1012_p10)   ;;  %v1334_v3 = vld [vmem:[%s1990_s7 + $0x10] sm:$0xff] (!%p1012_p10)  }
  0xde   : > { %361 = sbr.rel (%p1012_p10) target bundleno = 480 (0x1e0), region = 52  ;;  %1078 = vmatprep.subr.bf16.mxu0 (!%p1012_p10), %v1332_v1  ;;  %1142 = vmatprep.subr.bf16.mxu1 (!%p1012_p10), %v1332_v1  ;;  %v1335_v4 = vld [vmem:[%s1990_s7 + $0x18] sm:$0xff] (!%p1012_p10)   ;;  %v1340_v5 = vld [vmem:[%s1982_s16] sm:$0xff] (!%p1012_p10)   ;;  %v1337_v8 = vld [vmem:[%s1990_s7 + $0x28] sm:$0xff] (!%p1012_p10)  }
  0xdf   : > { %1079 = vmatpush3.bf16.msra.mxu0 (!%p1012_p10), %v1332_v1  ;;  %1150 = vmatpush3.bf16.msra.mxu1 (!%p1012_p10), %v1332_v1  ;;  %v1341_v6 = vld [vmem:[%s1982_s16 + $0x20] sm:$0xff] (!%p1012_p10)   ;;  %v1338_v9 = vld [vmem:[%s1990_s7 + $0x30] sm:$0xff] (!%p1012_p10)   ;;  %v1339_v10 = vld [vmem:[%s1990_s7 + $0x38] sm:$0xff] (!%p1012_p10)  }
  0xe0   : > { %1080 = vmatprep.subr.bf16.mxu0 (!%p1012_p10), %v1333_v2  ;;  %1143 = vmatprep.subr.bf16.mxu1 (!%p1012_p10), %v1333_v2  ;;  %v1336_v7 = vld [vmem:[%s1990_s7 + $0x20] sm:$0xff] (!%p1012_p10)   ;;  %v1342_v11 = vld [vmem:[%s1982_s16 + $0x8] sm:$0xff] (!%p1012_p10)   ;;  %v1344_v13 = vld [vmem:[%s1982_s16 + $0x10] sm:$0xff] (!%p1012_p10)  }
  0xe1   : > { %1094 = vmatprep.mubr.bf16.mxu0 (!%p1012_p10), %v1340_v5  ;;  %1102 = vmatprep.mubr.bf16.mxu1 (!%p1012_p10), %v1341_v6  ;;  %v1343_v12 = vld [vmem:[%s1982_s16 + $0x28] sm:$0xff] (!%p1012_p10)   ;;  %v1345_v14 = vld [vmem:[%s1982_s16 + $0x30] sm:$0xff] (!%p1012_p10)   ;;  %v1346_v15 = vld [vmem:[%s1982_s16 + $0x18] sm:$0xff] (!%p1012_p10)  }
  0xe2   : > { %v1347_v16 = vld [vmem:[%s1982_s16 + $0x38] sm:$0xff] (!%p1012_p10)   ;;  %v364_v17 = vld [vmem:[#allocation2 + $0x10] sm:$0xff] (!%p1012_p10)  ;;  %v362_v19 = vld [vmem:[#allocation2] sm:$0xff] (!%p1012_p10) }
  0xe3   : > { %1081 = vmatpush3.bf16.msra.mxu0 (!%p1012_p10), %v1333_v2  ;;  %1151 = vmatpush3.bf16.msra.mxu1 (!%p1012_p10), %v1333_v2  ;;  %v372_v18 = vld [vmem:[#allocation2 + $0x50] sm:$0xff] (!%p1012_p10)  ;;  %v370_v20 = vld [vmem:[#allocation2 + $0x40] sm:$0xff] (!%p1012_p10)  ;;  %v365_v23 = vld [vmem:[#allocation2 + $0x18] sm:$0xff] (!%p1012_p10) }
  0xe4   : > { %1082 = vmatprep.subr.bf16.mxu0 (!%p1012_p10), %v1334_v3  ;;  %1144 = vmatprep.subr.bf16.mxu1 (!%p1012_p10), %v1334_v3  ;;  %v373_v24 = vld [vmem:[#allocation2 + $0x58] sm:$0xff] (!%p1012_p10)  ;;  %v363_v29 = vld [vmem:[#allocation2 + $0x8] sm:$0xff] (!%p1012_p10)  ;;  %v368_v41 = vld [vmem:[#allocation2 + $0x30] sm:$0xff] (!%p1012_p10) }
  0xe5   : > { %v371_v30 = vld [vmem:[#allocation2 + $0x48] sm:$0xff]  ;;  %v376_v42 = vld [vmem:[#allocation2 + $0x70] sm:$0xff]  ;;  %v366_v43 = vld [vmem:[#allocation2 + $0x20] sm:$0xff] }
  0xe6   : > { %v374_v44 = vld [vmem:[#allocation2 + $0x60] sm:$0xff]  ;;  %v369_v47 = vld [vmem:[#allocation2 + $0x38] sm:$0xff]  ;;  %v367_v53 = vld [vmem:[#allocation2 + $0x28] sm:$0xff] }
  0xe7   : > { %1083 = vmatpush3.bf16.msra.mxu0 %v1334_v3  ;;  %1152 = vmatpush3.bf16.msra.mxu1 %v1334_v3  ;;  %v377_v48 = vld [vmem:[#allocation2 + $0x78] sm:$0xff]  ;;  %v375_v54 = vld [vmem:[#allocation2 + $0x68] sm:$0xff] }
  0xe8   : > { %1084 = vmatprep.subr.bf16.mxu0 %v1335_v4  ;;  %1145 = vmatprep.subr.bf16.mxu1 %v1335_v4 }
  0xeb   : > { %1085 = vmatpush3.bf16.msra.mxu0 %v1335_v4  ;;  %1153 = vmatpush3.bf16.msra.mxu1 %v1335_v4 }
  0xec   : > { %1086 = vmatprep.subr.bf16.mxu0 %v1336_v7  ;;  %1146 = vmatprep.subr.bf16.mxu1 %v1336_v7 }
  0xef   : > { %1087 = vmatpush3.bf16.msra.mxu0 %v1336_v7  ;;  %1154 = vmatpush3.bf16.msra.mxu1 %v1336_v7 }
  0xf0   : > { %1088 = vmatprep.subr.bf16.mxu0 %v1337_v8  ;;  %1147 = vmatprep.subr.bf16.mxu1 %v1337_v8 }
  0xf3   : > { %1089 = vmatpush3.bf16.msra.mxu0 %v1337_v8  ;;  %1155 = vmatpush3.bf16.msra.mxu1 %v1337_v8 }
  0xf4   : > { %1090 = vmatprep.subr.bf16.mxu0 %v1338_v9  ;;  %1148 = vmatprep.subr.bf16.mxu1 %v1338_v9 }
  0xf7   : > { %1091 = vmatpush3.bf16.msra.mxu0 %v1338_v9  ;;  %1156 = vmatpush3.bf16.msra.mxu1 %v1338_v9 }
  0xf8   : > { %1092 = vmatprep.subr.bf16.mxu0 %v1339_v10  ;;  %1149 = vmatprep.subr.bf16.mxu1 %v1339_v10 }
  0xfb   : > { %1093 = vmatpush3.bf16.msra.mxu0 %v1339_v10  ;;  %1157 = vmatpush3.bf16.msra.mxu1 %v1339_v10 }
  0xfe   : > { %1095 = vmatmul.mubr.bf16.vlgmr.msra.gmra.mrb[0].mxu0 %v1342_v11  ;;  %1103 = vmatmul.mubr.bf16.vlgmr.msra.gmra.mrb[0].mxu1 %v1343_v12 }
  0xff   : > { %1098 = vmatprep.mubr.bf16.mxu0 %v1344_v13  ;;  %1106 = vmatprep.mubr.bf16.mxu1 %v1345_v14 }
 0x106   : > { %1099 = vmatmul.mubr.bf16.gmra.mrb[4].mxu0 %v1346_v15  ;;  %1107 = vmatmul.mubr.bf16.gmra.mrb[4].mxu1 %v1347_v16 }
 0x1d1   : > { %v1096_v21 = vpop.f32.mrb[0].mxu0  ;;  %v1104_v22 = vpop.f32.mrb[0].mxu1 }
 0x1d2   : > { %v605_v25 = vadd.f32 %v1096_v21, %v364_v17  ;;  %v613_v26 = vadd.f32 %v1104_v22, %v372_v18  ;;  %v540_v27 = vpop.f32.mrb[1].mxu0  ;;  %v572_v28 = vpop.f32.mrb[1].mxu1 }
 0x1d3   : > { %v603_v31 = vadd.f32 %v540_v27, %v362_v19  ;;  %v611_v32 = vadd.f32 %v572_v28, %v370_v20  ;;  %v1097_v33 = vpop.f32.mrb[2].mxu0  ;;  %v1105_v34 = vpop.f32.mrb[2].mxu1 }
 0x1d4   : > { %621 = vst [vmem:[#allocation2 + $0x10] sm:$0xff] %v605_v25  ;;  %629 = vst [vmem:[#allocation2 + $0x50] sm:$0xff] %v613_v26  ;;  %v606_v35 = vadd.f32 %v1097_v33, %v365_v23  ;;  %v614_v36 = vadd.f32 %v1105_v34, %v373_v24  ;;  %v543_v37 = vpop.f32.mrb[3].mxu0  ;;  %v575_v38 = vpop.f32.mrb[3].mxu1 }
 0x1d5   : > { %619 = vst [vmem:[#allocation2] sm:$0xff] %v603_v31  ;;  %627 = vst [vmem:[#allocation2 + $0x40] sm:$0xff] %v611_v32  ;;  %v604_v39 = vadd.f32 %v543_v37, %v363_v29  ;;  %v612_v40 = vadd.f32 %v575_v38, %v371_v30 }
 0x1d6   : > { %622 = vst [vmem:[#allocation2 + $0x18] sm:$0xff] %v606_v35  ;;  %630 = vst [vmem:[#allocation2 + $0x58] sm:$0xff] %v614_v36 }
 0x1d7   : > { %620 = vst [vmem:[#allocation2 + $0x8] sm:$0xff] %v604_v39  ;;  %628 = vst [vmem:[#allocation2 + $0x48] sm:$0xff] %v612_v40 }
 0x1d9   : > { %v1100_v45 = vpop.f32.mrb[4].mxu0  ;;  %v1108_v46 = vpop.f32.mrb[4].mxu1 }
 0x1da   : > { %v609_v49 = vadd.f32 %v1100_v45, %v368_v41  ;;  %v617_v50 = vadd.f32 %v1108_v46, %v376_v42  ;;  %v556_v51 = vpop.f32.mrb[5].mxu0  ;;  %v588_v52 = vpop.f32.mrb[5].mxu1 }
 0x1db   : > { %v607_v55 = vadd.f32 %v556_v51, %v366_v43  ;;  %v615_v56 = vadd.f32 %v588_v52, %v374_v44  ;;  %v1101_v57 = vpop.f32.mrb[6].mxu0  ;;  %v1109_v58 = vpop.f32.mrb[6].mxu1 }
 0x1dc   : > { %625 = vst [vmem:[#allocation2 + $0x30] sm:$0xff] %v609_v49  ;;  %633 = vst [vmem:[#allocation2 + $0x70] sm:$0xff] %v617_v50  ;;  %v610_v59 = vadd.f32 %v1101_v57, %v369_v47  ;;  %v618_v60 = vadd.f32 %v1109_v58, %v377_v48  ;;  %v559_v61 = vpop.f32.mrb[7].mxu0  ;;  %v591_v62 = vpop.f32.mrb[7].mxu1 }
 0x1dd   : > { %623 = vst [vmem:[#allocation2 + $0x20] sm:$0xff] %v607_v55  ;;  %631 = vst [vmem:[#allocation2 + $0x60] sm:$0xff] %v615_v56  ;;  %v608_v63 = vadd.f32 %v559_v61, %v367_v53  ;;  %v616_v0 = vadd.f32 %v591_v62, %v375_v54 }
 0x1de   : > { %626 = vst [vmem:[#allocation2 + $0x38] sm:$0xff] %v610_v59  ;;  %634 = vst [vmem:[#allocation2 + $0x78] sm:$0xff] %v618_v60 }
 0x1df   : > { %624 = vst [vmem:[#allocation2 + $0x28] sm:$0xff] %v608_v63  ;;  %632 = vst [vmem:[#allocation2 + $0x68] sm:$0xff] %v616_v0 }
 0x1e0 PF: > { %s2197_s6 = sld [smem:[#allocation24_spill]] }
 0x1e6   : > { %p1029_p2 = scmp.ne.s32.totalorder %s2197_s6, 1 }
 0x1e7   : > { %v1348_v1 = vld [vmem:[#allocation11] sm:$0xff] (!%p1029_p2)   ;;  %v1349_v2 = vld [vmem:[#allocation11 + $0x8] sm:$0xff] (!%p1029_p2)   ;;  %v1350_v3 = vld [vmem:[#allocation11 + $0x10] sm:$0xff] (!%p1029_p2)  }
 0x1e8   : > { %638 = sbr.rel (%p1029_p2) target bundleno = 746 (0x2ea), region = 56  ;;  %1110 = vmatprep.subr.bf16.mxu0 (!%p1029_p2), %v1348_v1  ;;  %1158 = vmatprep.subr.bf16.mxu1 (!%p1029_p2), %v1348_v1  ;;  %v1351_v4 = vld [vmem:[#allocation11 + $0x18] sm:$0xff] (!%p1029_p2)   ;;  %v639_v5 = vld [vmem:[#allocation2] sm:$0xff] (!%p1029_p2)  ;;  %v640_v6 = vld [vmem:[#allocation2 + $0x8] sm:$0xff] (!%p1029_p2) }
 0x1e9   : > { %1111 = vmatpush3.bf16.msra.mxu0 (!%p1029_p2), %v1348_v1  ;;  %1166 = vmatpush3.bf16.msra.mxu1 (!%p1029_p2), %v1348_v1  ;;  %v647_v7 = vld [vmem:[#allocation2 + $0x40] sm:$0xff] (!%p1029_p2)  ;;  %v655_v8 = vpack.c.bf16 (!%p1029_p2), %v640_v6, %v639_v5  ;;  %v648_v9 = vld [vmem:[#allocation2 + $0x48] sm:$0xff] (!%p1029_p2)  ;;  %v1354_v13 = vld [vmem:[#allocation11 + $0x30] sm:$0xff] (!%p1029_p2)  }
 0x1ea   : > { %1112 = vmatprep.subr.bf16.mxu0 (!%p1029_p2), %v1349_v2  ;;  %1159 = vmatprep.subr.bf16.mxu1 (!%p1029_p2), %v1349_v2  ;;  %v659_v10 = vpack.c.bf16 (!%p1029_p2), %v648_v9, %v647_v7  ;;  %v1352_v11 = vld [vmem:[#allocation11 + $0x20] sm:$0xff] (!%p1029_p2)   ;;  %v1353_v12 = vld [vmem:[#allocation11 + $0x28] sm:$0xff] (!%p1029_p2)   ;;  %v1355_v14 = vld [vmem:[#allocation11 + $0x38] sm:$0xff] (!%p1029_p2)  }
 0x1eb   : > { %1126 = vmatprep.mubr.bf16.mxu0 (!%p1029_p2), %v655_v8  ;;  %v641_v15 = vld [vmem:[#allocation2 + $0x10] sm:$0xff] (!%p1029_p2)  ;;  %v642_v16 = vld [vmem:[#allocation2 + $0x18] sm:$0xff] (!%p1029_p2)  ;;  %v643_v19 = vld [vmem:[#allocation2 + $0x20] sm:$0xff] (!%p1029_p2) }
 0x1ec   : > { %1134 = vmatprep.mubr.bf16.mxu1 (!%p1029_p2), %v659_v10  ;;  %v649_v17 = vld [vmem:[#allocation2 + $0x50] sm:$0xff] (!%p1029_p2)  ;;  %v650_v18 = vld [vmem:[#allocation2 + $0x58] sm:$0xff] (!%p1029_p2)  ;;  %v644_v20 = vld [vmem:[#allocation2 + $0x28] sm:$0xff] (!%p1029_p2)  ;;  %v656_v23 = vpack.c.bf16 (!%p1029_p2), %v642_v16, %v641_v15 }
 0x1ed   : > { %1113 = vmatpush3.bf16.msra.mxu0 (!%p1029_p2), %v1349_v2  ;;  %1167 = vmatpush3.bf16.msra.mxu1 (!%p1029_p2), %v1349_v2  ;;  %v651_v21 = vld [vmem:[#allocation2 + $0x60] sm:$0xff] (!%p1029_p2)  ;;  %v652_v22 = vld [vmem:[#allocation2 + $0x68] sm:$0xff] (!%p1029_p2)  ;;  %v660_v24 = vpack.c.bf16 (!%p1029_p2), %v650_v18, %v649_v17  ;;  %v657_v25 = vpack.c.bf16 (!%p1029_p2), %v644_v20, %v643_v19  ;;  %v645_v27 = vld [vmem:[#allocation2 + $0x30] sm:$0xff] (!%p1029_p2) }
 0x1ee   : > { %1114 = vmatprep.subr.bf16.mxu0 (!%p1029_p2), %v1350_v3  ;;  %1160 = vmatprep.subr.bf16.mxu1 (!%p1029_p2), %v1350_v3  ;;  %v661_v26 = vpack.c.bf16 (!%p1029_p2), %v652_v22, %v651_v21  ;;  %v646_v28 = vld [vmem:[#allocation2 + $0x38] sm:$0xff] (!%p1029_p2)  ;;  %v653_v29 = vld [vmem:[#allocation2 + $0x70] sm:$0xff] (!%p1029_p2) }
 0x1ef   : > { %v654_v30 = vld [vmem:[#allocation2 + $0x78] sm:$0xff]  ;;  %v658_v31 = vpack.c.bf16 %v646_v28, %v645_v27 }
 0x1f0   : > { %v662_v32 = vpack.c.bf16 %v654_v30, %v653_v29 }
 0x1f1   : > { %1115 = vmatpush3.bf16.msra.mxu0 %v1350_v3  ;;  %1168 = vmatpush3.bf16.msra.mxu1 %v1350_v3 }
 0x1f2   : > { %1116 = vmatprep.subr.bf16.mxu0 %v1351_v4  ;;  %1161 = vmatprep.subr.bf16.mxu1 %v1351_v4 }
 0x1f5   : > { %1117 = vmatpush3.bf16.msra.mxu0 %v1351_v4  ;;  %1169 = vmatpush3.bf16.msra.mxu1 %v1351_v4 }
 0x1f6   : > { %1118 = vmatprep.subr.bf16.mxu0 %v1352_v11  ;;  %1162 = vmatprep.subr.bf16.mxu1 %v1352_v11 }
 0x1f9   : > { %1119 = vmatpush3.bf16.msra.mxu0 %v1352_v11  ;;  %1170 = vmatpush3.bf16.msra.mxu1 %v1352_v11 }
 0x1fa   : > { %1120 = vmatprep.subr.bf16.mxu0 %v1353_v12  ;;  %1163 = vmatprep.subr.bf16.mxu1 %v1353_v12 }
 0x1fd   : > { %1121 = vmatpush3.bf16.msra.mxu0 %v1353_v12  ;;  %1171 = vmatpush3.bf16.msra.mxu1 %v1353_v12 }
 0x1fe   : > { %1122 = vmatprep.subr.bf16.mxu0 %v1354_v13  ;;  %1164 = vmatprep.subr.bf16.mxu1 %v1354_v13 }
 0x201   : > { %1123 = vmatpush3.bf16.msra.mxu0 %v1354_v13  ;;  %1172 = vmatpush3.bf16.msra.mxu1 %v1354_v13 }
 0x202   : > { %1124 = vmatprep.subr.bf16.mxu0 %v1355_v14  ;;  %1165 = vmatprep.subr.bf16.mxu1 %v1355_v14 }
 0x205   : > { %1125 = vmatpush3.bf16.msra.mxu0 %v1355_v14  ;;  %1173 = vmatpush3.bf16.msra.mxu1 %v1355_v14 }
 0x208   : > { %1127 = vmatmul.mubr.bf16.vlgmr.msra.gmra.mrb[0].mxu0 %v656_v23  ;;  %1135 = vmatmul.mubr.bf16.vlgmr.msra.gmra.mrb[0].mxu1 %v660_v24 }
 0x209   : > { %1130 = vmatprep.mubr.bf16.mxu0 %v657_v25  ;;  %1138 = vmatprep.mubr.bf16.mxu1 %v661_v26 }
 0x210   : > { %1131 = vmatmul.mubr.bf16.gmra.mrb[4].mxu0 %v658_v31  ;;  %1139 = vmatmul.mubr.bf16.gmra.mrb[4].mxu1 %v662_v32 }
 0x2db   : > { %v1128_v33 = vpop.f32.mrb[0].mxu0  ;;  %v1136_v34 = vpop.f32.mrb[0].mxu1 }
 0x2dc   : > { %v826_v35 = vmax.f32 %v1128_v33, 0.0  ;;  %v834_v36 = vmax.f32 %v1136_v34, 0.0  ;;  %v761_v37 = vpop.f32.mrb[1].mxu0  ;;  %v793_v38 = vpop.f32.mrb[1].mxu1 }
 0x2dd   : > { %v824_v39 = vmax.f32 %v761_v37, 0.0  ;;  %v832_v40 = vmax.f32 %v793_v38, 0.0  ;;  %v1129_v41 = vpop.f32.mrb[2].mxu0  ;;  %v1137_v42 = vpop.f32.mrb[2].mxu1 }
 0x2de   : > { %842 = vst [vmem:[%s2003_s25 + $0x10] sm:$0xff] %v826_v35  ;;  %850 = vst [vmem:[%s2003_s25 + $0x50] sm:$0xff] %v834_v36  ;;  %v827_v43 = vmax.f32 %v1129_v41, 0.0  ;;  %v835_v44 = vmax.f32 %v1137_v42, 0.0  ;;  %v764_v45 = vpop.f32.mrb[3].mxu0  ;;  %v796_v46 = vpop.f32.mrb[3].mxu1 }
 0x2df   : > { %840 = vst [vmem:[%s2003_s25] sm:$0xff] %v824_v39  ;;  %848 = vst [vmem:[%s2003_s25 + $0x40] sm:$0xff] %v832_v40  ;;  %v825_v47 = vmax.f32 %v764_v45, 0.0  ;;  %v833_v48 = vmax.f32 %v796_v46, 0.0 }
 0x2e0   : > { %843 = vst [vmem:[%s2003_s25 + $0x18] sm:$0xff] %v827_v43  ;;  %851 = vst [vmem:[%s2003_s25 + $0x58] sm:$0xff] %v835_v44 }
 0x2e1   : > { %841 = vst [vmem:[%s2003_s25 + $0x8] sm:$0xff] %v825_v47  ;;  %849 = vst [vmem:[%s2003_s25 + $0x48] sm:$0xff] %v833_v48 }
 0x2e3   : > { %v1132_v49 = vpop.f32.mrb[4].mxu0  ;;  %v1140_v50 = vpop.f32.mrb[4].mxu1 }
 0x2e4   : > { %v830_v51 = vmax.f32 %v1132_v49, 0.0  ;;  %v838_v52 = vmax.f32 %v1140_v50, 0.0  ;;  %v777_v53 = vpop.f32.mrb[5].mxu0  ;;  %v809_v54 = vpop.f32.mrb[5].mxu1 }
 0x2e5   : > { %v828_v55 = vmax.f32 %v777_v53, 0.0  ;;  %v836_v56 = vmax.f32 %v809_v54, 0.0  ;;  %v1133_v57 = vpop.f32.mrb[6].mxu0  ;;  %v1141_v58 = vpop.f32.mrb[6].mxu1 }
 0x2e6   : > { %846 = vst [vmem:[%s2003_s25 + $0x30] sm:$0xff] %v830_v51  ;;  %854 = vst [vmem:[%s2003_s25 + $0x70] sm:$0xff] %v838_v52  ;;  %v831_v59 = vmax.f32 %v1133_v57, 0.0  ;;  %v839_v60 = vmax.f32 %v1141_v58, 0.0  ;;  %v780_v61 = vpop.f32.mrb[7].mxu0  ;;  %v812_v62 = vpop.f32.mrb[7].mxu1 }
 0x2e7   : > { %844 = vst [vmem:[%s2003_s25 + $0x20] sm:$0xff] %v828_v55  ;;  %852 = vst [vmem:[%s2003_s25 + $0x60] sm:$0xff] %v836_v56  ;;  %v829_v63 = vmax.f32 %v780_v61, 0.0  ;;  %v837_v0 = vmax.f32 %v812_v62, 0.0 }
 0x2e8   : > { %847 = vst [vmem:[%s2003_s25 + $0x38] sm:$0xff] %v831_v59  ;;  %855 = vst [vmem:[%s2003_s25 + $0x78] sm:$0xff] %v839_v60 }
 0x2e9   : > { %845 = vst [vmem:[%s2003_s25 + $0x28] sm:$0xff] %v829_v63  ;;  %853 = vst [vmem:[%s2003_s25 + $0x68] sm:$0xff] %v837_v0 }
 0x2ea PF: > { %s2198_s17 = sld [smem:[#allocation25_spill]]  ;;  %s2199_s15 = sld [smem:[#allocation28_spill]] }
 0x2eb   : > { %s2200_s18 = sld [smem:[#allocation35_spill]]  ;;  %s870_s16 = sshll.u32 %s2003_s25, 4  ;;  %s2048_s16 = int_to_ptr.vmem [resolvable:$true] %s870_s16 }
 0x2ec   : > { %s2052_s4 = scalar_lea.sflag [#allocation8], %s314_s22  ;;  %s1466_s8 = scalar_lea.vmem %s2048_s16, 2048 }
 0x2ed   : > { %p1467_p8 = scmp.ne.s32.totalorder %s2048_s16, %s1466_s8  ;;  %s1633_s27 = smov [#allocation12]  }
 0x2ee   : > { %s1470_s26 = sshll.u32 %s1633_s27, 4  ;;  %s1471_s26 = int_to_ptr.vmem [resolvable:$false] %s1470_s26 }
 0x2ef   : > { %s1472_s7 = scalar_lea.vmem %s1471_s26, 4096  ;;  %p1473_p6 = scmp.lt.s32.totalorder %s2048_s16, %s1471_s26 }
 0x2f0   : > { %s1045_s24 = sshll.u32 %s2198_s17, 11  ;;  %p2202_p11 = scmp.ne.s32.totalorder %s2199_s15, 0 }
 0x2f1   : > { %s2201_s28 = smov %s2200_s18  ;;  %s2045_s12 = scalar_lea.hbm %s2200_s18, %s1045_s24 }
 0x2f2   : > { %p1468_p0 = pnand %p1467_p8, %p2202_p11  ;;  %p1474_p9 = scmp.lt.s32.totalorder %s1472_s7, %s1466_s8 }
 0x2f4   : > { %p1469_p12 = pneg %p1468_p0  ;;  %p1475_p4 = por %p1474_p9, %p1473_p6 }
 0x2f6   : > { %p1476_p1 = pnand %p1475_p4, %p1469_p12 }
 0x2f8   : > { %1479 = shalt.err (!%p1476_p1)
}
 0x2f9   : > { %s1480_s22 = scalar_lea.hbm %s2045_s12, 2048  ;;  %s1484_s9 = scalar_lea.hbm %s2201_s28, 4096 }
 0x2fa   : > { %p1481_p7 = scmp.ne.s32.totalorder %s2045_s12, %s1480_s22  ;;  %p1485_p5 = scmp.lt.u32.totalorder %s2045_s12, %s2201_s28 }
 0x2fb   : > { %p1486_p10 = scmp.lt.u32.totalorder %s1484_s9, %s1480_s22  ;;  %p1488_p8 = scmp.lt.u32.totalorder %s1480_s22, %s2045_s12 }
 0x2fc   : > { %p1482_p13 = pnand %p1481_p7, %p2202_p11 }
 0x2fd   : > { %p1487_p2 = por %p1486_p10, %p1485_p5 }
 0x2fe   : > { %p1483_p3 = pneg %p1482_p13 }
 0x2ff   : > { %p1489_p0 = por %p1488_p8, %p1487_p2 }
 0x301   : > { %p1490_p12 = pnand %p1489_p0, %p1483_p3 }
 0x303   : > { %1493 = shalt.err (!%p1490_p12)
}
 0x304   : > { %s1634_s0 = smov 128   ;;  %s1635_s6 = smov 8  }
 0x305   : > { %1186 = dma.vmem_to_hbm [thread:$0]  (%p2202_p11), %s2048_s16, 2048, %s2045_s12, %s2052_s4, %s1634_s0, %s1634_s0, %s1635_s6  }
 0x306 PF: > { %s2203_s17 = sld [smem:[#allocation22_spill]]  ;;  %s2204_s24 = sld [smem:[#allocation29_spill]] }
 0x307   : > { %p1210_p6 = scmp.ge.s32.totalorder %s1622_s19, 2 }
 0x30c   : > { %s885_s21 = sand.u32 1, %s2203_s17   ;;  %p2205_p9 = scmp.ne.s32.totalorder %s2204_s24, 0 }
 0x30d   : > { %s886_s30 = scalar_lea.sflag [#allocation8], %s885_s21 }
 0x30e   : > { %p1204_p4 = pnand %p1210_p6, %p2205_p9 }
 0x310   : > { %1565 = dma.done.wait (!%p1204_p4), %s886_s30, 2048  }
 0x311   : > { %1567 = vsyncadd (!%p1204_p4), %s886_s30, 4294965248  ;;  %s32_s19 = sadd.s32 1, %s1622_s19   ;;  %s2207_s15 = sld [smem:[#allocation23_spill]] }
 0x312   : > { %p2081_p1 = scmp.ge.s32.totalorder %s32_s19, 6   ;;  %s2208_s8 = sld [smem:[#allocation32_spill]] }
 0x313   : > { %s2209_s16 = sld [smem:[#allocation33_spill]]  ;;  %s2210_s4 = sld [smem:[#allocation26_spill]] }
 0x314   : > { %s2211_s27 = sld [smem:[#allocation27_spill]]  ;;  %s2212_s17 = sld [smem:[#allocation30_spill]] }
 0x315   : > { %s2213_s26 = sld [smem:[#allocation31_spill]]  ;;  %s2215_s0 = smov %s1574_s1 }
 0x316   : > { %s2217_s9 = smov %s1586_s10  ;;  %s2218_s10 = smov %s1590_s11 }
 0x317   : > { %s2216_s1 = smov %s2207_s15  ;;  %s2219_s11 = smov %s1920_s29 }
 0x318   : > { %s2220_s12 = smov %s1598_s13  ;;  %s2221_s13 = smov %s1602_s14 }
 0x319   : > { %s2222_s14 = smov %s2209_s16  ;;  %s2223_s15 = smov %s2210_s4 }
 0x31a   : > { %s2224_s16 = smov %s2211_s27  ;;  %31 = sbr.rel (!%p2081_p1) target bundleno = 35 (0x23), region = 106 }
 0x31b   : > { %s2225_s18 = smov %s2213_s26 }
 0x321   :  { %891 = vsyncpa [#allocation7], 1 }
 0x322   :  { %893 = vsyncpa [#allocation7 + $0x1], 1 }
 0x323   :  { %894 = vsyncpa [#allocation10], 1 }
 0x324   :  { %896 = vsyncpa [#allocation10 + $0x1], 1 }
 0x325   :  { %897 = vsyncpa [#allocation8], 1 }
 0x326   :  { %899 = vsyncpa [#allocation8 + $0x1], 1 }

</bundles_post_ra>
